<compile_context>
chip_gen: v5e
topology: v5e:2x2
jax: 0.10.0
libtpu: 0.0.40
codegen_flags: <defaults>
</compile_context>

<pallas_src>
import jax
import jax.numpy as jnp
from jax.experimental import pallas as pl
from jax.experimental.pallas import tpu as pltpu


def gcn_kernel(x_ref, w1bd_ref, b1_ref, w2_ref, o_ref):
    # x_ref:    (S, B*N)      packed input, lane-dense (B*N multiple of 128)
    # w1bd_ref: (B*N, B*N)    block-diagonal W1^T  (kron(I_B, W1^T))
    # b1_ref:   (1, B*N)      bias tiled across batches
    # w2_ref:   (S, S)
    # o_ref:    (S, B*N)      packed output, lane-dense store
    x = x_ref[...]

    # conv1 (1x1 conv over node axis) as a single lane-dense MXU matmul + bias.
    h = jnp.dot(x, w1bd_ref[...], preferred_element_type=jnp.float32) + b1_ref[...]

    # residual subtract (VPU; free filler under the MXU work)
    h = h - x

    # conv2 (1x1 conv over state axis, bias=False) + ReLU; result is (S, B*N).
    out = jnp.dot(w2_ref[...], h, preferred_element_type=jnp.float32)
    o_ref[...] = jnp.maximum(out, 0.0).astype(o_ref.dtype)


def gcn_forward(x, w1, b1, w2):
    """x: (B, S, N) f32; w1: (N, N); b1: (N,); w2: (S, S)."""
    B, S, N = x.shape
    BN = B * N

    # --- wrapper-side layout plumbing (cheap XLA ops on tiny tensors) -------
    # Pack batch into the lane axis: (B, S, N) -> (S, B*N).
    x_pk = jnp.transpose(x, (1, 0, 2)).reshape(S, BN)
    # Block-diagonal conv1 weight so conv1 over nodes stays batch-local while
    # being a single 128-lane matmul:  w1bd[b*N+m, b*N+n] = W1^T[m, n].
    w1bd = jnp.kron(jnp.eye(B, dtype=w1.dtype), w1.T)          # (B*N, B*N)
    b1_pk = jnp.tile(b1, B).reshape(1, BN)                     # (1, B*N)

    out_pk = pl.pallas_call(
        gcn_kernel,
        out_shape=jax.ShapeDtypeStruct((S, BN), x.dtype),
        grid_spec=pltpu.PrefetchScalarGridSpec(
            num_scalar_prefetch=0,
            grid=(1,),                                         # single step
            in_specs=[
                pl.BlockSpec((S, BN), lambda i: (0, 0)),       # x packed
                pl.BlockSpec((BN, BN), lambda i: (0, 0)),      # block-diag W1^T
                pl.BlockSpec((1, BN), lambda i: (0, 0)),       # bias
                pl.BlockSpec((S, S), lambda i: (0, 0)),        # W2
            ],
            out_specs=pl.BlockSpec((S, BN), lambda i: (0, 0)),
        ),
        compiler_params=pltpu.CompilerParams(
            dimension_semantics=("arbitrary",),
        ),
    )(x_pk, w1bd, b1_pk, w2)

    # Unpack (S, B*N) -> (B, S, N).
    return jnp.transpose(out_pk.reshape(S, B, N), (1, 0, 2))


def gcn_reference(x, w1, b1, w2):
    # Plain-JAX reference mirroring the PyTorch forward.
    h1 = jnp.einsum("bsm,nm->bsn", x, w1) + b1[None, None, :]
    h2 = h1 - x
    out = jnp.einsum("os,bsn->bon", w2, h2)
    return jnp.maximum(out, 0.0)


if __name__ == "__main__":
    B, S, N = 2, 32, 64          # batch, num_state, num_node  (B*N = 128 lanes)

    key = jax.random.PRNGKey(0)
    kx, k1, kb, k2 = jax.random.split(key, 4)

    x = jax.random.normal(kx, (B, S, N), dtype=jnp.float32)
    # Deterministic synthetic parameters (shapes match nn.Conv1d 1x1 kernels).
    w1 = jax.random.normal(k1, (N, N), dtype=jnp.float32) * (1.0 / jnp.sqrt(N))
    b1 = jax.random.normal(kb, (N,), dtype=jnp.float32) * 0.1
    w2 = jax.random.normal(k2, (S, S), dtype=jnp.float32) * (1.0 / jnp.sqrt(S))

    out = jax.jit(gcn_forward)(x, w1, b1, w2)
    out = jax.block_until_ready(out)

    ref = gcn_reference(x, w1, b1, w2)
    assert out.shape == (B, S, N)
    assert jnp.allclose(out, ref, atol=1e-4, rtol=1e-4)

    print("KERNEL_OK")
</pallas_src>

<mosaic_0001>
module attributes {stable_mosaic.version = 11 : i64} {
  func.func @gcn_kernel(%arg0: i32, %arg1: memref<32x128xf32, #tpu.memory_space<vmem>>, %arg2: memref<128x128xf32, #tpu.memory_space<vmem>>, %arg3: memref<1x128xf32, #tpu.memory_space<vmem>>, %arg4: memref<32x32xf32, #tpu.memory_space<vmem>>, %arg5: memref<32x128xf32, #tpu.memory_space<vmem>>) attributes {dimension_semantics = [#tpu.dimension_semantics<arbitrary>], iteration_bounds = array<i64: 1>, scalar_prefetch = 0 : i64, scratch_operands = 0 : i64, tpu.core_type = #tpu.core_type<tc>, window_params = [{pipeline_mode = #tpu.pipeline_mode<synchronous>, transform_indices = @transform_0, window_bounds = array<i64: 32, 128>}, {pipeline_mode = #tpu.pipeline_mode<synchronous>, transform_indices = @transform_1, window_bounds = array<i64: 128, 128>}, {pipeline_mode = #tpu.pipeline_mode<synchronous>, transform_indices = @transform_2, window_bounds = array<i64: 1, 128>}, {pipeline_mode = #tpu.pipeline_mode<synchronous>, transform_indices = @transform_3, window_bounds = array<i64: 32, 32>}, {pipeline_mode = #tpu.pipeline_mode<synchronous>, transform_indices = @transform_4, window_bounds = array<i64: 32, 128>}]} {
    %c0 = arith.constant 0 : index
    %c0_0 = arith.constant 0 : index
    %0 = vector.load %arg1[%c0, %c0_0] : memref<32x128xf32, #tpu.memory_space<vmem>>, vector<32x128xf32>
    %c0_1 = arith.constant 0 : index
    %c0_2 = arith.constant 0 : index
    %1 = vector.load %arg2[%c0_1, %c0_2] : memref<128x128xf32, #tpu.memory_space<vmem>>, vector<128x128xf32>
    %cst = arith.constant dense<0.000000e+00> : vector<32x128xf32>
    %2 = tpu.matmul %0, %1, %cst {dimension_numbers = #tpu.dot_dimension_numbers<[1], [0], [0], [1], [0, 0, 1, 1], [], []>} : vector<32x128xf32>, vector<128x128xf32>, vector<32x128xf32> -> vector<32x128xf32>
    %c0_3 = arith.constant 0 : index
    %c0_4 = arith.constant 0 : index
    %3 = vector.load %arg3[%c0_3, %c0_4] : memref<1x128xf32, #tpu.memory_space<vmem>>, vector<1x128xf32>
    %4 = vector.broadcast %3 : vector<1x128xf32> to vector<32x128xf32>
    %5 = arith.addf %2, %4 : vector<32x128xf32>
    %6 = arith.subf %5, %0 : vector<32x128xf32>
    %c0_5 = arith.constant 0 : index
    %c0_6 = arith.constant 0 : index
    %7 = vector.load %arg4[%c0_5, %c0_6] : memref<32x32xf32, #tpu.memory_space<vmem>>, vector<32x32xf32>
    %cst_7 = arith.constant dense<0.000000e+00> : vector<32x128xf32>
    %8 = tpu.matmul %7, %6, %cst_7 {dimension_numbers = #tpu.dot_dimension_numbers<[1], [0], [0], [1], [0, 0, 1, 1], [], []>} : vector<32x32xf32>, vector<32x128xf32>, vector<32x128xf32> -> vector<32x128xf32>
    %cst_8 = arith.constant 0.000000e+00 : f32
    %9 = vector.broadcast %cst_8 : f32 to vector<32x128xf32>
    %10 = arith.maximumf %8, %9 : vector<32x128xf32>
    %c0_9 = arith.constant 0 : index
    %c0_10 = arith.constant 0 : index
    %11 = vector.load %arg5[%c0_9, %c0_10] : memref<32x128xf32, #tpu.memory_space<vmem>>, vector<32x128xf32>
    tpu.vector_store %arg5[%c0_9, %c0_10], %10 {strides = array<i32>} : memref<32x128xf32, #tpu.memory_space<vmem>>, vector<32x128xf32>,
    return
  }
  func.func @transform_0(%arg0: i32) -> (i32, i32) {
    %c0_i32 = arith.constant 0 : i32
    %c0_i32_0 = arith.constant 0 : i32
    %c0_i32_1 = arith.constant 0 : i32
    return %c0_i32, %c0_i32_0 : i32, i32
  }
  func.func @transform_1(%arg0: i32) -> (i32, i32) {
    %c0_i32 = arith.constant 0 : i32
    %c0_i32_0 = arith.constant 0 : i32
    %c0_i32_1 = arith.constant 0 : i32
    return %c0_i32, %c0_i32_0 : i32, i32
  }
  func.func @transform_2(%arg0: i32) -> (i32, i32) {
    %c0_i32 = arith.constant 0 : i32
    %c0_i32_0 = arith.constant 0 : i32
    %c0_i32_1 = arith.constant 0 : i32
    return %c0_i32, %c0_i32_0 : i32, i32
  }
  func.func @transform_3(%arg0: i32) -> (i32, i32) {
    %c0_i32 = arith.constant 0 : i32
    %c0_i32_0 = arith.constant 0 : i32
    %c0_i32_1 = arith.constant 0 : i32
    return %c0_i32, %c0_i32_0 : i32, i32
  }
  func.func @transform_4(%arg0: i32) -> (i32, i32) {
    %c0_i32 = arith.constant 0 : i32
    %c0_i32_0 = arith.constant 0 : i32
    %c0_i32_1 = arith.constant 0 : i32
    return %c0_i32, %c0_i32_0 : i32, i32
  }
}

</mosaic_0001>

<bundles_post_ra>
// kernel: tile.8
= control target key start
LH: loop header
LB: loop body
LE: loop exit
PB: predicated region body
PF: predicated region fallthrough
CT: control target
= control target key end

     0   :  { %s22_s0 = inlined_call_operand.vmem [shape: f32[64], index: 0, kind: input, shape index: {}]   ;;  %s23_s1 = inlined_call_operand.vmem [shape: f32[2,64], index: 1, kind: output, shape index: {}]  }
   0x1   :  { %v4_v0 = vld [vmem:[%s22_s0] ss:$0 sm:$0xff] }
   0x2   :  { %5 = vst [vmem:[%s23_s1] sm:$0x3] %v4_v0 }

// kernel: tile.9
= control target key start
LH: loop header
LB: loop body
LE: loop exit
PB: predicated region body
PF: predicated region fallthrough
CT: control target
= control target key end

     0   :  { %vm7_vm0 = vcmask 523264   ;;  %vm13_vm1 = vcmask 1048064   ;;  %s39_s0 = inlined_call_operand.vmem [shape: f32[2,64], index: 0, kind: input, shape index: {}]   ;;  %s40_s1 = inlined_call_operand.vmem [shape: f32[1,128], index: 1, kind: output, shape index: {}]  }
   0x1   :  { %v4_v0 = vld [vmem:[%s39_s0] sm:$0x3]  ;;  %s22_s0 = smov 64  }
   0x2   :  { %5 = vst [vmem:[#allocation1] sm:$0x3] %v4_v0 }
   0x9   :  { %v10_v1 = vld [vmem:[#allocation1 + $0x1] sm:$0x1]   ;;  %v6_v2 = vld [vmem:[#allocation1] sm:$0x1]  }
   0xa   :  { %11 = vrot.lane.b32.xlu0 %v10_v1, %s22_s0  ;;  %8 = vst.msk [vmem:[#allocation0] sm:$0x1] %vm7_vm0, %v6_v2  }
  0x7c   :  { %v12_v3 = vpop.permute.xlu0 %11  }
  0x7d   :  { %14 = vst.msk [vmem:[#allocation0] sm:$0x1] %vm13_vm1, %v12_v3  }
  0x84   :  { %v17_v4 = vld [vmem:[#allocation0] sm:$0x1] }
  0x85   :  { %20 = vst [vmem:[%s40_s1] sm:$0x1] %v17_v4 }

// kernel: gcn_forward.1
= control target key start
LH: loop header
LB: loop body
LE: loop exit
PB: predicated region body
PF: predicated region fallthrough
CT: control target
= control target key end

     0   :  { %vm78_vm0 = vcmask 261120   ;;  %s281_s1 = inlined_call_operand.vmem [shape: f32[128,128], index: 1, kind: input, shape index: {}]   ;;  %s282_s2 = inlined_call_operand.vmem [shape: f32[1,128], index: 2, kind: input, shape index: {}]   ;;  %s283_s0 = inlined_call_operand.vmem [shape: f32[32,128], index: 0, kind: input, shape index: {}]   ;;  %s284_s3 = inlined_call_operand.vmem [shape: f32[32,32], index: 3, kind: input, shape index: {}]   ;;  %s285_s4 = inlined_call_operand.vmem [shape: f32[32,128], index: 4, kind: output, shape index: {}]  }
   0x1   :  { %v36_v0 = vld [vmem:[%s281_s1 + $0x78] sm:$0xff]  ;;  %v35_v1 = vld [vmem:[%s281_s1 + $0x70] sm:$0xff]  ;;  %v34_v2 = vld [vmem:[%s281_s1 + $0x68] sm:$0xff] }
   0x2   :  { %137 = vmatpush.msra.mxu3 %v36_v0  ;;  %136 = vmatpush.msra.mxu2 %v36_v0  ;;  %v33_v3 = vld [vmem:[%s281_s1 + $0x60] sm:$0xff]  ;;  %v32_v4 = vld [vmem:[%s281_s1 + $0x58] sm:$0xff]  ;;  %v31_v5 = vld [vmem:[%s281_s1 + $0x50] sm:$0xff] }
   0x3   :  { %41 = vmatpush.msra.mxu0 %v36_v0  ;;  %v30_v6 = vld [vmem:[%s281_s1 + $0x48] sm:$0xff]  ;;  %v29_v7 = vld [vmem:[%s281_s1 + $0x40] sm:$0xff]  ;;  %v28_v8 = vld [vmem:[%s281_s1 + $0x38] sm:$0xff] }
   0x4   :  { %139 = vmatpush.msra.mxu3 %v35_v1  ;;  %138 = vmatpush.msra.mxu2 %v35_v1  ;;  %v27_v9 = vld [vmem:[%s281_s1 + $0x30] sm:$0xff]  ;;  %v26_v10 = vld [vmem:[%s281_s1 + $0x28] sm:$0xff]  ;;  %v25_v11 = vld [vmem:[%s281_s1 + $0x20] sm:$0xff] }
   0x5   :  { %42 = vmatpush.msra.mxu0 %v35_v1  ;;  %v24_v12 = vld [vmem:[%s281_s1 + $0x18] sm:$0xff]  ;;  %v23_v13 = vld [vmem:[%s281_s1 + $0x10] sm:$0xff]  ;;  %v22_v14 = vld [vmem:[%s281_s1 + $0x8] sm:$0xff] }
   0x6   :  { %141 = vmatpush.msra.mxu3 %v34_v2  ;;  %140 = vmatpush.msra.mxu2 %v34_v2  ;;  %v21_v15 = vld [vmem:[%s281_s1] sm:$0xff]  ;;  %v19_v16 = vld [vmem:[%s283_s0 + $0x10] sm:$0xff]  ;;  %v18_v17 = vld [vmem:[%s283_s0 + $0x8] sm:$0xff] }
   0x7   :  { %43 = vmatpush.msra.mxu0 %v34_v2  ;;  %v17_v18 = vld [vmem:[%s283_s0] sm:$0xff]  ;;  %v20_v19 = vld [vmem:[%s283_s0 + $0x18] sm:$0xff]  ;;  %v75_v34 = vld [vmem:[%s284_s3 + $0x8] sm:$0xff] }
   0x8   :  { %143 = vmatpush.msra.mxu3 %v33_v3  ;;  %142 = vmatpush.msra.mxu2 %v33_v3  ;;  %v168_v21 = vld [vmem:[%s282_s2] ss:$0 sm:$0xff]  ;;  %v76_v35 = vld [vmem:[%s284_s3 + $0x10] sm:$0xff]  ;;  %v77_v36 = vld [vmem:[%s284_s3 + $0x18] sm:$0xff] }
   0x9   :  { %44 = vmatpush.msra.mxu0 %v33_v3  ;;  %v74_v33 = vld [vmem:[%s284_s3] sm:$0xff] }
   0xa   :  { %145 = vmatpush.msra.mxu3 %v32_v4  ;;  %144 = vmatpush.msra.mxu2 %v32_v4 }
   0xb   :  { %45 = vmatpush.msra.mxu0 %v32_v4 }
   0xc   :  { %147 = vmatpush.msra.mxu3 %v31_v5  ;;  %146 = vmatpush.msra.mxu2 %v31_v5 }
   0xd   :  { %46 = vmatpush.msra.mxu0 %v31_v5 }
   0xe   :  { %149 = vmatpush.msra.mxu3 %v30_v6  ;;  %148 = vmatpush.msra.mxu2 %v30_v6 }
   0xf   :  { %47 = vmatpush.msra.mxu0 %v30_v6 }
  0x10   :  { %151 = vmatpush.msra.mxu3 %v29_v7  ;;  %150 = vmatpush.msra.mxu2 %v29_v7 }
  0x11   :  { %48 = vmatpush.msra.mxu0 %v29_v7 }
  0x12   :  { %153 = vmatpush.msra.mxu3 %v28_v8  ;;  %152 = vmatpush.msra.mxu2 %v28_v8 }
  0x13   :  { %49 = vmatpush.msra.mxu0 %v28_v8 }
  0x14   :  { %155 = vmatpush.msra.mxu3 %v27_v9  ;;  %154 = vmatpush.msra.mxu2 %v27_v9 }
  0x15   :  { %50 = vmatpush.msra.mxu0 %v27_v9 }
  0x16   :  { %157 = vmatpush.msra.mxu3 %v26_v10  ;;  %156 = vmatpush.msra.mxu2 %v26_v10 }
  0x17   :  { %51 = vmatpush.msra.mxu0 %v26_v10 }
  0x18   :  { %159 = vmatpush.msra.mxu3 %v25_v11  ;;  %158 = vmatpush.msra.mxu2 %v25_v11 }
  0x19   :  { %52 = vmatpush.msra.mxu0 %v25_v11 }
  0x1a   :  { %161 = vmatpush.msra.mxu3 %v24_v12  ;;  %160 = vmatpush.msra.mxu2 %v24_v12 }
  0x1b   :  { %53 = vmatpush.msra.mxu0 %v24_v12 }
  0x1c   :  { %163 = vmatpush.msra.mxu3 %v23_v13  ;;  %162 = vmatpush.msra.mxu2 %v23_v13 }
  0x1d   :  { %54 = vmatpush.msra.mxu0 %v23_v13 }
  0x1e   :  { %165 = vmatpush.msra.mxu3 %v22_v14  ;;  %164 = vmatpush.msra.mxu2 %v22_v14 }
  0x1f   :  { %55 = vmatpush.msra.mxu0 %v22_v14 }
  0x20   :  { %167 = vmatpush.msra.mxu3 %v21_v15  ;;  %166 = vmatpush.msra.mxu2 %v21_v15 }
  0x21   :  { %63 = vmatmul.f32.vlgmr.msra.gmra.mxu3 %v19_v16  ;;  %60 = vmatmul.f32.vlgmr.msra.gmra.mxu2 %v18_v17 }
  0x22   :  { %56 = vmatpush.msra.mxu0 %v21_v15 }
  0x23   :  { %57 = vmatmul.f32.vlgmr.msra.gmra.mxu0 %v17_v18 }
  0x29   :  { %66 = vmatmul.f32.gmra.mxu3 %v20_v19 }
  0xa0   :  { %v58_v24 = vpop.f32.mrf.mxu0 }
  0xa1   :  { %v59_v29 = vadd.f32 %v168_v21, %v58_v24 }
  0xa3   :  { %v70_v32 = vsub.f32 %v59_v29, %v17_v18 }
  0xa4   :  { %v64_v20 = vpop.f32.mrf.mxu3  ;;  %v61_v22 = vpop.f32.mrf.mxu2 }
  0xa5   :  { %v65_v25 = vadd.f32 %v168_v21, %v64_v20  ;;  %v62_v27 = vadd.f32 %v168_v21, %v61_v22 }
  0xa7   :  { %v72_v30 = vsub.f32 %v65_v25, %v19_v16  ;;  %v71_v31 = vsub.f32 %v62_v27, %v18_v17 }
  0xac   :  { %v67_v23 = vpop.f32.mrf.mxu3 }
  0xad   :  { %v68_v26 = vadd.f32 %v168_v21, %v67_v23 }
  0xaf   :  { %v73_v28 = vsub.f32 %v68_v26, %v20_v19 }
  0xb1   :  { %103 = vmatpush.msra.mxu1 %v73_v28 }
  0xb3   :  { %104 = vmatpush.msra.mxu1 %v72_v30 }
  0xb5   :  { %105 = vmatpush.msra.mxu1 %v71_v31 }
  0xb7   :  { %106 = vmatpush.msra.mxu1 %v70_v32 }
  0xb8   :  { %132 = vmatmul.msk.f32.vlgmr.msra.gmra.mxu1 %vm78_vm0, %v74_v33 }
  0xc0   :  { %133 = vmatmul.msk.f32.gmra.mxu1 %vm78_vm0, %v75_v34 }
  0xc8   :  { %134 = vmatmul.msk.f32.gmra.mxu1 %vm78_vm0, %v76_v35 }
  0xd0   :  { %135 = vmatmul.msk.f32.gmra.mxu1 %vm78_vm0, %v77_v36 }
 0x135   :  { %v108_v37 = vpop.f32.mrf.mxu1 }
 0x136   :  { %v120_v38 = vmax.f32 %v108_v37, 0.0 }
 0x138   :  { %124 = vst [vmem:[%s285_s4] sm:$0xff] %v120_v38 }
 0x13d   :  { %v111_v39 = vpop.f32.mrf.mxu1 }
 0x13e   :  { %v121_v40 = vmax.f32 %v111_v39, 0.0 }
 0x140   :  { %125 = vst [vmem:[%s285_s4 + $0x8] sm:$0xff] %v121_v40 }
 0x145   :  { %v114_v41 = vpop.f32.mrf.mxu1 }
 0x146   :  { %v122_v42 = vmax.f32 %v114_v41, 0.0 }
 0x148   :  { %126 = vst [vmem:[%s285_s4 + $0x10] sm:$0xff] %v122_v42 }
 0x14d   :  { %v117_v43 = vpop.f32.mrf.mxu1 }
 0x14e   :  { %v123_v44 = vmax.f32 %v117_v43, 0.0 }
 0x150   :  { %127 = vst [vmem:[%s285_s4 + $0x18] sm:$0xff] %v123_v44 }

</bundles_post_ra>
